<compile_context>
chip_gen: v7x
topology: tpu7x:2x2x1
jax: 0.10.0
libtpu: 0.0.40
codegen_flags: <defaults>
</compile_context>

<pallas_src>
from functools import partial

import jax
import jax.numpy as jnp
from jax.experimental import pallas as pl
from jax.experimental.pallas import tpu as pltpu

STATE_DIM = 4     # CartPole-v1 observation_space.shape[0]
ACTION_DIM = 2    # CartPole-v1 action_space.n
H1 = 64
H2 = 32

LANES = 128       # pad every feature axis of the packed params to 128 lanes
X_PAD = 8         # state dim padded to one f32 sublane group

# Row layout of the packed parameter slab (all offsets are multiples of 8 so
# every static slice inside the kernel is (8,128)-tile aligned):
W1_R0, W1_R1 = 0, 8          # rows 0:4   = w1 (4,64)  in cols 0:64, rest 0
B1_ROW = 8                   # row  8     = b1 (64,)   in cols 0:64
W2_R0, W2_R1 = 16, 144       # rows 16:80 = w2 (64,32) in cols 0:32, rest 0
B2_ROW = 144                 # row 144    = b2 (32,)   in cols 0:32
W3_R0, W3_R1 = 152, 280      # rows 152:184 = w3 (32,2) in cols 0:2, rest 0
B3_ROW = 280                 # row 280    = b3 (2,)    in cols 0:2
SLAB_ROWS = 288


def _round_up(n, m):
    return ((n + m - 1) // m) * m


def policy_net_kernel(x_ref, p_ref, out_ref, *, mxu_dtype=jnp.float32):
    """x_ref: (TB, X_PAD) f32, p_ref: (SLAB_ROWS, LANES) f32 packed params,
    out_ref: (TB, ACTION_DIM) f32 action probabilities."""

    def mm(a, b):
        # Optionally feed the MXU bf16 inputs (single pass on v6e/v7x); always
        # accumulate in f32.
        return jnp.dot(a.astype(mxu_dtype), b.astype(mxu_dtype),
                       preferred_element_type=jnp.float32)

    x = x_ref[...]                                   # (TB, 8), cols 4:8 are 0

    # fc1 + ReLU  (padded lanes/rows of w1/b1 are zero -> h1 cols 64:128 == 0)
    w1 = p_ref[W1_R0:W1_R1, :]                       # (8, 128)
    b1 = p_ref[B1_ROW:B1_ROW + 1, :]                 # (1, 128)
    h1 = jnp.maximum(mm(x, w1) + b1, 0.0)            # (TB, 128)

    # fc2 + ReLU
    w2 = p_ref[W2_R0:W2_R1, :]                       # (128, 128)
    b2 = p_ref[B2_ROW:B2_ROW + 1, :]                 # (1, 128)
    h2 = jnp.maximum(mm(h1, w2) + b2, 0.0)           # (TB, 128)

    # action head
    w3 = p_ref[W3_R0:W3_R1, :]                       # (128, 128)
    b3 = p_ref[B3_ROW:B3_ROW + 1, :]                 # (1, 128)
    logits = mm(h2, w3) + b3                         # (TB, 128); cols 0:2 real

    # softmax over exactly 2 classes == sigmoid closed form (no cross-lane
    # max/sum reductions over the padded 128-lane axis), all f32.
    l0 = logits[:, 0:1]
    l1 = logits[:, 1:2]
    p0 = 1.0 / (1.0 + jnp.exp(l1 - l0))              # == softmax(...)[:, 0]
    out_ref[:, 0:1] = p0
    out_ref[:, 1:2] = 1.0 - p0


def pack_params(params):
    """Pack (w1,b1,w2,b2,w3,b3) once into a single 128-lane-padded f32 slab.

    Weights are stored (in_features, out_features) so the kernel computes
    x @ W + b, numerically identical to PyTorch's x @ W_pt.T + b.
    """
    w1, b1, w2, b2, w3, b3 = params
    slab = jnp.zeros((SLAB_ROWS, LANES), jnp.float32)
    slab = slab.at[W1_R0:W1_R0 + STATE_DIM, 0:H1].set(w1.astype(jnp.float32))
    slab = slab.at[B1_ROW, 0:H1].set(b1.reshape(H1).astype(jnp.float32))
    slab = slab.at[W2_R0:W2_R0 + H1, 0:H2].set(w2.astype(jnp.float32))
    slab = slab.at[B2_ROW, 0:H2].set(b2.reshape(H2).astype(jnp.float32))
    slab = slab.at[W3_R0:W3_R0 + H2, 0:ACTION_DIM].set(w3.astype(jnp.float32))
    slab = slab.at[B3_ROW, 0:ACTION_DIM].set(b3.reshape(ACTION_DIM).astype(jnp.float32))
    return slab


def policy_net_forward(x, packed_params, *, max_tile=512, mxu_dtype=jnp.float32):
    """x: (B, STATE_DIM) f32 -> action_probs: (B, ACTION_DIM) f32."""
    B = x.shape[0]
    # Batch tile: up to 512 rows, always a multiple of 8 (f32 sublane).
    TB = min(max_tile, _round_up(max(B, 1), 8))
    B_pad = _round_up(B, TB)

    # Pad batch to a whole number of tiles and state dim to one sublane group;
    # pad rows produce garbage that is sliced off below (never written back
    # into caller-visible rows).
    x_pad = jnp.zeros((B_pad, X_PAD), jnp.float32).at[:B, :STATE_DIM].set(
        x.astype(jnp.float32))

    out = pl.pallas_call(
        partial(policy_net_kernel, mxu_dtype=mxu_dtype),
        out_shape=jax.ShapeDtypeStruct((B_pad, ACTION_DIM), jnp.float32),
        grid=(B_pad // TB,),
        in_specs=[
            # activations stream over the batch grid
            pl.BlockSpec((TB, X_PAD), lambda i: (i, 0)),
            # packed params: constant block index -> fetched once, VMEM-resident
            pl.BlockSpec((SLAB_ROWS, LANES), lambda i: (0, 0)),
        ],
        out_specs=pl.BlockSpec((TB, ACTION_DIM), lambda i: (i, 0)),
        compiler_params=pltpu.CompilerParams(
            dimension_semantics=("parallel",)),  # shard batch tiles across TCs (v7x)
    )(x_pad, packed_params)

    return out[:B]


def policy_net_ref(x, params):
    """Pure-JAX f32 reference (HIGHEST precision matmuls) of the PyTorch forward."""
    w1, b1, w2, b2, w3, b3 = params
    hi = jax.lax.Precision.HIGHEST
    h1 = jnp.maximum(jnp.dot(x, w1, precision=hi) + b1, 0.0)
    h2 = jnp.maximum(jnp.dot(h1, w2, precision=hi) + b2, 0.0)
    logits = jnp.dot(h2, w3, precision=hi) + b3
    return jax.nn.softmax(logits, axis=-1)


def init_params(key):
    """Deterministic init mimicking nn.Linear's U(-1/sqrt(fan_in), 1/sqrt(fan_in))."""
    def linear(k, fan_in, fan_out):
        kw, kb = jax.random.split(k)
        bound = 1.0 / jnp.sqrt(fan_in)
        w = jax.random.uniform(kw, (fan_in, fan_out), jnp.float32, -bound, bound)
        b = jax.random.uniform(kb, (1, fan_out), jnp.float32, -bound, bound)
        return w, b

    k1, k2, k3 = jax.random.split(key, 3)
    w1, b1 = linear(k1, STATE_DIM, H1)
    w2, b2 = linear(k2, H1, H2)
    w3, b3 = linear(k3, H2, ACTION_DIM)
    return (w1, b1, w2, b2, w3, b3)


# TODO(synk): gym environment stepping and torch.distributions.Categorical
# sampling/log_prob are host-side control flow, not part of the forward pass,
# and are intentionally not implemented as kernels.

if __name__ == "__main__":
    key = jax.random.PRNGKey(0)
    k_params, k_x1, k_x2 = jax.random.split(key, 3)

    params = init_params(k_params)
    packed = pack_params(params)  # pack once, reuse across calls

    # Small batch (typical policy step).
    batch = 8
    x = jax.random.normal(k_x1, (batch, STATE_DIM), dtype=jnp.float32)
    probs = jax.block_until_ready(policy_net_forward(x, packed))
    ref = policy_net_ref(x, params)
    assert probs.shape == (batch, ACTION_DIM)
    assert jnp.allclose(jnp.sum(probs, axis=-1), 1.0, atol=1e-5)
    assert jnp.allclose(probs, ref, atol=1e-5, rtol=1e-5)

    # Larger ragged batch exercising the batch grid (multiple 512-row tiles + pad).
    big = 1037
    x_big = jax.random.normal(k_x2, (big, STATE_DIM), dtype=jnp.float32)
    probs_big = jax.block_until_ready(policy_net_forward(x_big, packed))
    ref_big = policy_net_ref(x_big, params)
    assert probs_big.shape == (big, ACTION_DIM)
    assert jnp.allclose(jnp.sum(probs_big, axis=-1), 1.0, atol=1e-5)
    assert jnp.allclose(probs_big, ref_big, atol=1e-5, rtol=1e-5)

    print("KERNEL_OK")
</pallas_src>

<mosaic_0001>
module attributes {stable_mosaic.version = 11 : i64} {
  func.func @policy_net_kernel(%arg0: i32, %arg1: memref<8x8xf32, #tpu.memory_space<vmem>>, %arg2: memref<288x128xf32, #tpu.memory_space<vmem>>, %arg3: memref<8x2xf32, #tpu.memory_space<vmem>>) attributes {dimension_semantics = [#tpu.dimension_semantics<parallel>], iteration_bounds = array<i64: 1>, scalar_prefetch = 0 : i64, scratch_operands = 0 : i64, tpu.core_type = #tpu.core_type<tc>, window_params = [{transform_indices = @transform_0, window_bounds = array<i64: 8, 8>}, {pipeline_mode = #tpu.pipeline_mode<synchronous>, transform_indices = @transform_1, window_bounds = array<i64: 288, 128>}, {transform_indices = @transform_2, window_bounds = array<i64: 8, 2>}]} {
    %c0 = arith.constant 0 : index
    %c0_0 = arith.constant 0 : index
    %0 = vector.load %arg1[%c0, %c0_0] : memref<8x8xf32, #tpu.memory_space<vmem>>, vector<8x8xf32>
    %c0_1 = arith.constant 0 : index
    %c0_2 = arith.constant 0 : index
    %1 = vector.load %arg2[%c0_1, %c0_2] : memref<288x128xf32, #tpu.memory_space<vmem>>, vector<8x128xf32>
    %c8 = arith.constant 8 : index
    %c0_3 = arith.constant 0 : index
    %2 = vector.load %arg2[%c8, %c0_3] : memref<288x128xf32, #tpu.memory_space<vmem>>, vector<1x128xf32>
    %cst = arith.constant dense<0.000000e+00> : vector<8x128xf32>
    %3 = tpu.matmul %0, %1, %cst {dimension_numbers = #tpu.dot_dimension_numbers<[1], [0], [0], [1], [0, 0, 1, 1], [], []>} : vector<8x8xf32>, vector<8x128xf32>, vector<8x128xf32> -> vector<8x128xf32>
    %4 = vector.broadcast %2 : vector<1x128xf32> to vector<8x128xf32>
    %5 = arith.addf %3, %4 : vector<8x128xf32>
    %cst_4 = arith.constant 0.000000e+00 : f32
    %6 = vector.broadcast %cst_4 : f32 to vector<8x128xf32>
    %7 = arith.maximumf %5, %6 : vector<8x128xf32>
    %c16 = arith.constant 16 : index
    %c0_5 = arith.constant 0 : index
    %8 = vector.load %arg2[%c16, %c0_5] : memref<288x128xf32, #tpu.memory_space<vmem>>, vector<128x128xf32>
    %c144 = arith.constant 144 : index
    %c0_6 = arith.constant 0 : index
    %9 = vector.load %arg2[%c144, %c0_6] : memref<288x128xf32, #tpu.memory_space<vmem>>, vector<1x128xf32>
    %cst_7 = arith.constant dense<0.000000e+00> : vector<8x128xf32>
    %10 = tpu.matmul %7, %8, %cst_7 {dimension_numbers = #tpu.dot_dimension_numbers<[1], [0], [0], [1], [0, 0, 1, 1], [], []>} : vector<8x128xf32>, vector<128x128xf32>, vector<8x128xf32> -> vector<8x128xf32>
    %11 = vector.broadcast %9 : vector<1x128xf32> to vector<8x128xf32>
    %12 = arith.addf %10, %11 : vector<8x128xf32>
    %cst_8 = arith.constant 0.000000e+00 : f32
    %13 = vector.broadcast %cst_8 : f32 to vector<8x128xf32>
    %14 = arith.maximumf %12, %13 : vector<8x128xf32>
    %c152 = arith.constant 152 : index
    %c0_9 = arith.constant 0 : index
    %15 = vector.load %arg2[%c152, %c0_9] : memref<288x128xf32, #tpu.memory_space<vmem>>, vector<128x128xf32>
    %c280 = arith.constant 280 : index
    %c0_10 = arith.constant 0 : index
    %16 = vector.load %arg2[%c280, %c0_10] : memref<288x128xf32, #tpu.memory_space<vmem>>, vector<1x128xf32>
    %cst_11 = arith.constant dense<0.000000e+00> : vector<8x128xf32>
    %17 = tpu.matmul %14, %15, %cst_11 {dimension_numbers = #tpu.dot_dimension_numbers<[1], [0], [0], [1], [0, 0, 1, 1], [], []>} : vector<8x128xf32>, vector<128x128xf32>, vector<8x128xf32> -> vector<8x128xf32>
    %18 = vector.broadcast %16 : vector<1x128xf32> to vector<8x128xf32>
    %19 = arith.addf %17, %18 : vector<8x128xf32>
    %20 = vector.extract_strided_slice %19 {offsets = [0, 0], sizes = [8, 1], strides = [1, 1]} : vector<8x128xf32> to vector<8x1xf32>
    %21 = vector.extract_strided_slice %19 {offsets = [0, 1], sizes = [8, 1], strides = [1, 1]} : vector<8x128xf32> to vector<8x1xf32>
    %22 = arith.subf %21, %20 : vector<8x1xf32>
    %23 = math.exp %22 : vector<8x1xf32>
    %cst_12 = arith.constant 1.000000e+00 : f32
    %24 = vector.broadcast %cst_12 : f32 to vector<8x1xf32>
    %25 = arith.addf %24, %23 : vector<8x1xf32>
    %cst_13 = arith.constant 1.000000e+00 : f32
    %26 = vector.broadcast %cst_13 : f32 to vector<8x1xf32>
    %27 = arith.divf %26, %25 : vector<8x1xf32>
    %c0_14 = arith.constant 0 : index
    %c0_15 = arith.constant 0 : index
    %28 = vector.load %arg3[%c0_14, %c0_15] : memref<8x2xf32, #tpu.memory_space<vmem>>, vector<8x1xf32>
    tpu.vector_store %arg3[%c0_14, %c0_15], %27 {strides = array<i32>} : memref<8x2xf32, #tpu.memory_space<vmem>>, vector<8x1xf32>,
    %cst_16 = arith.constant 1.000000e+00 : f32
    %29 = vector.broadcast %cst_16 : f32 to vector<8x1xf32>
    %30 = arith.subf %29, %27 : vector<8x1xf32>
    %c0_17 = arith.constant 0 : index
    %c1 = arith.constant 1 : index
    %31 = vector.load %arg3[%c0_17, %c1] : memref<8x2xf32, #tpu.memory_space<vmem>>, vector<8x1xf32>
    tpu.vector_store %arg3[%c0_17, %c1], %30 {strides = array<i32>} : memref<8x2xf32, #tpu.memory_space<vmem>>, vector<8x1xf32>,
    return
  }
  func.func @transform_0(%arg0: i32) -> (i32, i32) {
    %c0_i32 = arith.constant 0 : i32
    %c0_i32_0 = arith.constant 0 : i32
    return %arg0, %c0_i32 : i32, i32
  }
  func.func @transform_1(%arg0: i32) -> (i32, i32) {
    %c0_i32 = arith.constant 0 : i32
    %c0_i32_0 = arith.constant 0 : i32
    %c0_i32_1 = arith.constant 0 : i32
    return %c0_i32, %c0_i32_0 : i32, i32
  }
  func.func @transform_2(%arg0: i32) -> (i32, i32) {
    %c0_i32 = arith.constant 0 : i32
    %c0_i32_0 = arith.constant 0 : i32
    return %arg0, %c0_i32 : i32, i32
  }
}

</mosaic_0001>

<bundles_post_ra>
// kernel: tpu_custom_call.1
= control target key start
LH: loop header
LB: loop body
LE: loop exit
PB: predicated region body
PF: predicated region fallthrough
CT: control target
= control target key end

     0   :  { %7 = vsyncpa [#allocation3], 0  ;;  %s631_s0 = inlined_call_operand.hbm [shape: f32[8,8], index: 0, kind: input, shape index: {}]   ;;  %s632_s1 = inlined_call_operand.hbm [shape: f32[288,128], index: 1, kind: input, shape index: {}]   ;;  %s633_s2 = inlined_call_operand.vmem [shape: f32[8,2], index: 2, kind: output, shape index: {}]  }
   0x1   :  { %8 = vsyncpa [#allocation5], 0  ;;  %s551_s9 = smov [#allocation2]   ;;  %s552_s11 = smov [#allocation4]  }
   0x2   :  { %s15_s10 = sshll.u32 %s551_s9, 4  ;;  %s24_s12 = sshll.u32 %s552_s11, 4  ;;  %s16_s10 = int_to_ptr.vmem [resolvable:$true] %s15_s10  ;;  %s575_s12 = int_to_ptr.vmem [resolvable:$true] %s24_s12 }
   0x3   :  { %s503_s15 = scalar_lea.hbm %s631_s0, 128 }
   0x4   :  { %p504_p0 = scmp.ne.s32.totalorder %s631_s0, %s503_s15  ;;  %p507_p1 = scmp.lt.u32.totalorder %s503_s15, %s631_s0 }
   0x6   :  { %p509_p2 = pnand %p507_p1, %p504_p0 }
   0x8   :  { %512 = shalt.err (!%p509_p2)
}
   0x9   :  { %s513_s20 = scalar_lea.vmem %s16_s10, 128  ;;  %p518_p4 = scmp.lt.s32.totalorder %s16_s10, %s16_s10 }
   0xa   :  { %p514_p3 = scmp.ne.s32.totalorder %s16_s10, %s513_s20  ;;  %p519_p5 = scmp.lt.s32.totalorder %s513_s20, %s513_s20 }
   0xc   :  { %p520_p6 = por %p519_p5, %p518_p4 }
   0xe   :  { %p521_p7 = pnand %p520_p6, %p514_p3 }
  0x10   :  { %524 = shalt.err (!%p521_p7)
}
  0x11   :  { %18 = dma.hbm_to_vmem [thread:$0]  %s631_s0, 128, %s16_s10, [#allocation3]  }
  0x12   :  { %s525_s25 = scalar_lea.hbm %s632_s1, 4608 }
  0x13   :  { %p526_p8 = scmp.ne.s32.totalorder %s632_s1, %s525_s25  ;;  %p529_p9 = scmp.lt.u32.totalorder %s525_s25, %s632_s1 }
  0x15   :  { %p531_p10 = pnand %p529_p9, %p526_p8 }
  0x17   :  { %534 = shalt.err (!%p531_p10)
}
  0x18   :  { %s535_s30 = scalar_lea.vmem %s575_s12, 4608  ;;  %p540_p12 = scmp.lt.s32.totalorder %s575_s12, %s575_s12 }
  0x19   :  { %p536_p11 = scmp.ne.s32.totalorder %s575_s12, %s535_s30  ;;  %p541_p13 = scmp.lt.s32.totalorder %s535_s30, %s535_s30 }
  0x1b   :  { %p542_p0 = por %p541_p13, %p540_p12 }
  0x1d   :  { %p543_p1 = pnand %p542_p0, %p536_p11 }
  0x1f   :  { %546 = shalt.err (!%p543_p1)
}
  0x20   :  { %s553_s0 = smov 128   ;;  %s554_s3 = smov 8  }
  0x21   :  { %30 = dma.hbm_to_vmem [thread:$0]  %s632_s1, 4608, %s575_s12, [#allocation5], %s553_s0, %s553_s0, %s554_s3  }
  0x22   :  { %547 = dma.done.wait [#allocation3], 128  }
  0x23   :  { %548 = vsyncadd [#allocation3], 4294967168 }
  0x24   :  { %549 = dma.done.wait [#allocation5], 4608  }
  0x25   :  { %550 = vsyncadd [#allocation5], 4294962688  ;;  %v555_v0 = vmov 0.0   ;;  %vm556_vm0 = vmmov 0   ;;  %v557_v1 = vmov 0.0|0.0   ;;  %vm44_vm1 = vcmask 64512  }
  0x26   :  { %367 = vmatprep.subr.mxu0 %v555_v0  ;;  %369 = vmatprep.mubr.msk.f32.mxu0 %vm556_vm0, %v555_v0  ;;  %v38_v2 = vld [vmem:[#allocation4] sm:$0xff]  ;;  %v37_v3 = vld [vmem:[#allocation2] sm:$0xff]  ;;  %v119_v4 = vld [vmem:[#allocation4 + $0x10] sm:$0xff]  ;;  %s558_s1 = smov 1   ;;  %s559_s6 = smov 127   ;;  %vm316_vm2 = vcmask 7168  }
  0x27   :  { %442 = vmatprep.subr.bf16.mxu1 %v557_v1  ;;  %404 = vmatprep.mubr.msk.f32.mxu1 %vm556_vm0, %v555_v0  ;;  %v120_v5 = vld [vmem:[#allocation4 + $0x18] sm:$0xff]  ;;  %v121_v6 = vld [vmem:[#allocation4 + $0x20] sm:$0xff]  ;;  %v122_v7 = vld [vmem:[#allocation4 + $0x28] sm:$0xff]  ;;  %vm319_vm3 = vcmask 15368  }
  0x28   :  { %368 = vmatpush3.msra.mxu0 %v38_v2  ;;  %v443_v8 = vpack.c.bf16 %v120_v5, %v119_v4  ;;  %v446_v9 = vpack.c.bf16 %v122_v7, %v121_v6  ;;  %v123_v10 = vld [vmem:[#allocation4 + $0x30] sm:$0xff]  ;;  %v124_v11 = vld [vmem:[#allocation4 + $0x38] sm:$0xff]  ;;  %v125_v13 = vld [vmem:[#allocation4 + $0x40] sm:$0xff] }
  0x29   :  { %370 = vmatmul.mubr.msk.f32.vlgmr.msra.gmra.mrb[0].mxu0 %vm44_vm1, %v37_v3  ;;  %466 = vmatprep.subr.bf16.mxu0 %v557_v1  ;;  %v449_v12 = vpack.c.bf16 %v124_v11, %v123_v10  ;;  %v126_v14 = vld [vmem:[#allocation4 + $0x48] sm:$0xff]  ;;  %v127_v16 = vld [vmem:[#allocation4 + $0x50] sm:$0xff]  ;;  %v128_v17 = vld [vmem:[#allocation4 + $0x58] sm:$0xff] }
  0x2a   :  { %439 = vmatprep.mubr.msk.f32.mxu0 %vm556_vm0, %v555_v0  ;;  %444 = vmatpush3.bf16.msra.mxu1 %v443_v8  ;;  %v452_v15 = vpack.c.bf16 %v126_v14, %v125_v13  ;;  %v455_v18 = vpack.c.bf16 %v128_v17, %v127_v16  ;;  %v129_v19 = vld [vmem:[#allocation4 + $0x60] sm:$0xff]  ;;  %v130_v20 = vld [vmem:[#allocation4 + $0x68] sm:$0xff]  ;;  %v131_v22 = vld [vmem:[#allocation4 + $0x70] sm:$0xff] }
  0x2b   :  { %445 = vmatprep.subr.bf16.mxu1 %v557_v1  ;;  %v458_v21 = vpack.c.bf16 %v130_v20, %v129_v19  ;;  %v132_v23 = vld [vmem:[#allocation4 + $0x78] sm:$0xff]  ;;  %v133_v25 = vld [vmem:[#allocation4 + $0x80] sm:$0xff]  ;;  %v134_v26 = vld [vmem:[#allocation4 + $0x88] sm:$0xff] }
  0x2c   :  { %v461_v24 = vpack.c.bf16 %v132_v23, %v131_v22  ;;  %v464_v27 = vpack.c.bf16 %v134_v26, %v133_v25  ;;  %v211_v28 = vld [vmem:[#allocation4 + $0x98] sm:$0xff]  ;;  %v212_v29 = vld [vmem:[#allocation4 + $0xa0] sm:$0xff]  ;;  %v213_v30 = vld [vmem:[#allocation4 + $0xa8] sm:$0xff] }
  0x2d   :  { %v467_v31 = vpack.c.bf16 %v212_v29, %v211_v28  ;;  %v214_v32 = vld [vmem:[#allocation4 + $0xb0] sm:$0xff]  ;;  %v215_v34 = vld [vmem:[#allocation4 + $0xb8] sm:$0xff]  ;;  %v216_v35 = vld [vmem:[#allocation4 + $0xc0] sm:$0xff] }
  0x2e   :  { %447 = vmatpush3.bf16.msra.mxu1 %v446_v9  ;;  %v470_v33 = vpack.c.bf16 %v214_v32, %v213_v30  ;;  %v473_v36 = vpack.c.bf16 %v216_v35, %v215_v34  ;;  %v217_v37 = vld [vmem:[#allocation4 + $0xc8] sm:$0xff]  ;;  %v218_v38 = vld [vmem:[#allocation4 + $0xd0] sm:$0xff]  ;;  %v219_v40 = vld [vmem:[#allocation4 + $0xd8] sm:$0xff] }
  0x2f   :  { %448 = vmatprep.subr.bf16.mxu1 %v557_v1  ;;  %468 = vmatpush3.bf16.msra.mxu0 %v467_v31  ;;  %v476_v39 = vpack.c.bf16 %v218_v38, %v217_v37  ;;  %v220_v41 = vld [vmem:[#allocation4 + $0xe0] sm:$0xff]  ;;  %v221_v43 = vld [vmem:[#allocation4 + $0xe8] sm:$0xff]  ;;  %v222_v44 = vld [vmem:[#allocation4 + $0xf0] sm:$0xff] }
  0x30   :  { %469 = vmatprep.subr.bf16.mxu0 %v557_v1  ;;  %v479_v42 = vpack.c.bf16 %v220_v41, %v219_v40  ;;  %v482_v45 = vpack.c.bf16 %v222_v44, %v221_v43  ;;  %v223_v46 = vld [vmem:[#allocation4 + $0xf8] sm:$0xff]  ;;  %v224_v47 = vld [vmem:[#allocation4 + $0x100] sm:$0xff]  ;;  %v327_v49 = vld [vmem:[#allocation4 + $0x8] ss:$0 sm:$0xff] }
  0x31   :  { %v485_v48 = vpack.c.bf16 %v224_v47, %v223_v46  ;;  %v225_v54 = vld [vmem:[#allocation4 + $0x108] sm:$0xff]  ;;  %v226_v55 = vld [vmem:[#allocation4 + $0x110] sm:$0xff]  ;;  %v330_v62 = vld [vmem:[#allocation4 + $0x118] ss:$0 sm:$0xff] }
  0x32   :  { %450 = vmatpush3.bf16.msra.mxu1 %v449_v12  ;;  %v488_v56 = vpack.c.bf16 %v226_v55, %v225_v54  ;;  %v329_v57 = vld [vmem:[#allocation4 + $0x90] ss:$0 sm:$0xff] }
  0x33   :  { %451 = vmatprep.subr.bf16.mxu1 %v557_v1  ;;  %471 = vmatpush3.bf16.msra.mxu0 %v470_v33 }
  0x34   :  { %472 = vmatprep.subr.bf16.mxu0 %v557_v1 }
  0x36   :  { %453 = vmatpush3.bf16.msra.mxu1 %v452_v15 }
  0x37   :  { %454 = vmatprep.subr.bf16.mxu1 %v557_v1  ;;  %474 = vmatpush3.bf16.msra.mxu0 %v473_v36 }
  0x38   :  { %475 = vmatprep.subr.bf16.mxu0 %v557_v1 }
  0x3a   :  { %456 = vmatpush3.bf16.msra.mxu1 %v455_v18 }
  0x3b   :  { %457 = vmatprep.subr.bf16.mxu1 %v557_v1  ;;  %477 = vmatpush3.bf16.msra.mxu0 %v476_v39 }
  0x3c   :  { %478 = vmatprep.subr.bf16.mxu0 %v557_v1 }
  0x3e   :  { %459 = vmatpush3.bf16.msra.mxu1 %v458_v21 }
  0x3f   :  { %460 = vmatprep.subr.bf16.mxu1 %v557_v1  ;;  %480 = vmatpush3.bf16.msra.mxu0 %v479_v42 }
  0x40   :  { %481 = vmatprep.subr.bf16.mxu0 %v557_v1 }
  0x42   :  { %462 = vmatpush3.bf16.msra.mxu1 %v461_v24 }
  0x43   :  { %463 = vmatprep.subr.bf16.mxu1 %v557_v1  ;;  %483 = vmatpush3.bf16.msra.mxu0 %v482_v45 }
  0x44   :  { %484 = vmatprep.subr.bf16.mxu0 %v557_v1 }
  0x46   :  { %465 = vmatpush3.bf16.msra.mxu1 %v464_v27 }
  0x47   :  { %486 = vmatpush3.bf16.msra.mxu0 %v485_v48 }
  0x48   :  { %487 = vmatprep.subr.bf16.mxu0 %v557_v1 }
  0x4b   :  { %489 = vmatpush3.bf16.msra.mxu0 %v488_v56 }
  0xfc   :  { %v114_v50 = vpop.f32.mrb[0].mxu0 }
  0xfd   :  { %v115_v51 = vadd.f32 %v327_v49, %v114_v50  ;;  %v371_v52 = vpop.f32.mrb[1].mxu0 }
  0xff   :  { %v118_v53 = vmax.f32 %v115_v51, 0.0 }
 0x101   :  { %405 = vmatmul.mubr.f32.vlgmr.msra.gmra.mrb[0].mxu1 %v118_v53 }
 0x1d4   :  { %v206_v58 = vpop.f32.mrb[0].mxu1 }
 0x1d5   :  { %v207_v59 = vadd.f32 %v329_v57, %v206_v58  ;;  %v406_v60 = vpop.f32.mrb[1].mxu1 }
 0x1d7   :  { %v210_v61 = vmax.f32 %v207_v59, 0.0 }
 0x1d9   :  { %440 = vmatmul.mubr.f32.vlgmr.msra.gmra.mrb[2].mxu0 %v210_v61 }
 0x2ac   :  { %v298_v63 = vpop.f32.mrb[2].mxu0 }
 0x2ad   :  { %v299_v0 = vadd.f32 %v330_v62, %v298_v63  ;;  %v441_v1 = vpop.f32.mrb[3].mxu0 }
 0x2af   :  { %303 = vrot.lane.b32.xlu0 %v299_v0, %s558_s1 }
 0x321   :  { %v304_v2 = vpop.permute.xlu0 %303 }
 0x322   :  { %v306_v3 = vsub.f32 %v299_v0, %v304_v2 }
 0x324   :  { %v307_v4 = vmul.f32 1.442695, %v306_v3 }
 0x326   :  { %499 = vpow2.f32 %v307_v4 }
 0x330   :  { %v500_v5 = vpop.eup %499 }
 0x331   :  { %v309_v6 = vadd.f32 1.0, %v500_v5 }
 0x333   :  { %501 = vrcp.f32 %v309_v6 }
 0x33d   :  { %v502_v7 = vpop.eup %501 }
 0x33e   :  { %313 = vrot.lane.b32.xlu0 %v502_v7, %s559_s6  ;;  %v318_v9 = vsub.f32 1.0, %v502_v7 }
 0x3b0   :  { %v314_v8 = vpop.permute.xlu0 %313 }
 0x3b1   :  { %317 = vst.msk [vmem:[%s633_s2] sm:$0xff] %vm316_vm2, %v314_v8 }
 0x3b2   :  { %320 = vst.msk [vmem:[%s633_s2] sm:$0xff] %vm319_vm3, %v318_v9 }
 0x3b3   :  { %325 = vsyncpa [#allocation3], 1 }
 0x3b4   :  { %326 = vsyncpa [#allocation5], 1 }

</bundles_post_ra>
